<compile_context>
chip_gen: v7x
topology: tpu7x:2x2x1
jax: 0.10.0
libtpu: 0.0.40
codegen_flags: <defaults>
</compile_context>

<pallas_src>
import jax
import jax.numpy as jnp
from jax.experimental import pallas as pl
from jax.experimental.pallas import tpu as pltpu


def _round_up(x, m):
    return ((x + m - 1) // m) * m


def _vmem_capacity_bytes():
    # Generation-aware VMEM capacity (128 MiB on v5e/v6e, 64 MiB per TC on v7x).
    try:
        cap = getattr(pltpu.get_tpu_info(), "vmem_capacity_bytes", None)
        if cap:
            return int(cap)
    except Exception:
        pass
    return 64 << 20  # conservative fallback: safe on every generation


def _ffn_kernel(x_ref, w1_ref, b1_ref, w2_ref, b2_ref, o_ref):
    # x_ref: (TM, H) token tile at its native dtype; weights are full (H, H)
    # resident blocks in the compute dtype; biases are (1, H) f32.
    x = x_ref[...]
    xc = x.astype(w1_ref.dtype)                       # MXU operand cast (VPU, free here)
    h = jnp.dot(xc, w1_ref[...], preferred_element_type=jnp.float32) + b1_ref[...]
    h = jnp.maximum(h, 0.0)                           # ReLU (dropout = identity in eval)
    y = jnp.dot(h.astype(w2_ref.dtype), w2_ref[...],
                preferred_element_type=jnp.float32) + b2_ref[...]
    # Residual add with the un-cast x, in f32, then cast to the output dtype.
    o_ref[...] = (y + x.astype(jnp.float32)).astype(o_ref.dtype)


def prepare_ffn_params(w1, b1, w2, b2, compute_dtype=jnp.bfloat16):
    """One-time weight prep (hoist out of the per-call serving path).
    w1, w2: (H_out, H_in) Conv1d(k=1) weights with the kernel dim squeezed."""
    w1_t = jnp.asarray(w1).T.astype(compute_dtype)
    w2_t = jnp.asarray(w2).T.astype(compute_dtype)
    b1_r = jnp.asarray(b1).astype(jnp.float32).reshape(1, -1)
    b2_r = jnp.asarray(b2).astype(jnp.float32).reshape(1, -1)
    return w1_t, b1_r, w2_t, b2_r


def pointwise_ffn_prepared(x, w1_t, b1_r, w2_t, b2_r, *, tile_m=512):
    """x: (B, L, H). w1_t/w2_t: (H, H) pre-transposed weights in the compute dtype.
    b1_r/b2_r: (1, H) f32 biases. Returns (B, L, H) in x.dtype."""
    B, L, H = x.shape
    M = B * L
    out_dtype = x.dtype
    compute_dtype = w1_t.dtype

    x_bytes = jnp.dtype(x.dtype).itemsize
    out_bytes = jnp.dtype(out_dtype).itemsize
    dt_bytes = jnp.dtype(compute_dtype).itemsize

    # Sublane multiple for the token tile (8 for f32, 16 for bf16, 32 for 8-bit).
    min_sublane = max(8, 32 // x_bytes, 32 // dt_bytes)

    def vmem_estimate(tm):
        weights = 2 * H * H * dt_bytes                 # W1^T, W2^T: single-buffered
        biases = 2 * 2 * H * 4                         # f32, conservative
        io = 2 * tm * H * (x_bytes + out_bytes)        # x + out, double-buffered
        interm = 4 * tm * H * 4                        # f32 intermediates / casts
        return weights + biases + io + interm

    vmem_cap = _vmem_capacity_bytes()
    # Leave headroom for compiler-internal scratch / semaphores:
    # 128 MiB parts -> ~112 MiB limit, v7x 64 MiB/TC -> ~56 MiB limit.
    vmem_limit = max(16 << 20, vmem_cap - max(8 << 20, vmem_cap // 8))
    vmem_budget = int(vmem_limit * 0.85)

    # Token tile: as large as requested, multiple of the sublane minimum,
    # shrunk only if the resident-weight + streaming footprint overflows VMEM.
    tile_m_eff = max(min_sublane, min(int(tile_m), _round_up(M, min_sublane)))
    tile_m_eff = _round_up(tile_m_eff, min_sublane)
    while tile_m_eff > min_sublane and vmem_estimate(tile_m_eff) > vmem_budget:
        tile_m_eff = max(min_sublane, _round_up(tile_m_eff // 2, min_sublane))

    # Give the grid at least 2 steps when possible so v7x's second TensorCore
    # (dimension_semantics="parallel") is not left idle.
    while tile_m_eff > min_sublane and pl.cdiv(M, tile_m_eff) < 2:
        tile_m_eff = max(min_sublane, _round_up(tile_m_eff // 2, min_sublane))

    grid = (pl.cdiv(M, tile_m_eff),)

    x2 = x.reshape(M, H)  # free: no pad, no cast, no extra HBM pass

    cost = pl.CostEstimate(
        flops=4 * M * H * H,
        transcendentals=0,
        bytes_accessed=(M * H * (x_bytes + out_bytes)   # x in + out
                        + 2 * H * H * dt_bytes          # weights
                        + 2 * H * 4),                   # biases
    )

    out = pl.pallas_call(
        _ffn_kernel,
        out_shape=jax.ShapeDtypeStruct((M, H), out_dtype),
        grid_spec=pltpu.PrefetchScalarGridSpec(
            num_scalar_prefetch=0,
            grid=grid,
            in_specs=[
                # Streaming token tile (native dtype): default double-buffering.
                pl.BlockSpec((tile_m_eff, H), lambda i: (i, 0)),
                # Constant operands: resident, single-buffered.
                pl.BlockSpec((H, H), lambda i: (0, 0),
                             pipeline_mode=pl.Buffered(1)),   # W1^T
                pl.BlockSpec((1, H), lambda i: (0, 0),
                             pipeline_mode=pl.Buffered(1)),   # b1
                pl.BlockSpec((H, H), lambda i: (0, 0),
                             pipeline_mode=pl.Buffered(1)),   # W2^T
                pl.BlockSpec((1, H), lambda i: (0, 0),
                             pipeline_mode=pl.Buffered(1)),   # b2
            ],
            out_specs=pl.BlockSpec((tile_m_eff, H), lambda i: (i, 0)),
        ),
        compiler_params=pltpu.CompilerParams(
            dimension_semantics=("parallel",),
            vmem_limit_bytes=int(vmem_limit),
        ),
        cost_estimate=cost,
    )(x2, w1_t, b1_r, w2_t, b2_r)

    return out.reshape(B, L, H)


def pointwise_ffn(x, w1, b1, w2, b2, *, tile_m=512, compute_dtype=None):
    """Convenience wrapper: preps weights and runs the kernel.
    For serving, call prepare_ffn_params() once and reuse pointwise_ffn_prepared."""
    if compute_dtype is None:
        # bf16 MXU operands by default on f32 inputs; accumulation and the
        # residual add stay in f32 (residual uses the un-cast x).
        compute_dtype = jnp.bfloat16 if x.dtype == jnp.float32 else x.dtype
    params = prepare_ffn_params(w1, b1, w2, b2, compute_dtype)
    return pointwise_ffn_prepared(x, *params, tile_m=tile_m)


def reference_ffn(x, w1, b1, w2, b2):
    # Pure-JAX reference matching the PyTorch module (eval mode).
    h = jnp.einsum("blh,oh->blo", x, w1) + b1
    h = jnp.maximum(h, 0.0)
    y = jnp.einsum("blh,oh->blo", h, w2) + b2
    return y + x


if __name__ == "__main__":
    B, L, H = 2, 8, 32  # batch, seq length, hidden_units
    key = jax.random.PRNGKey(0)
    kx, k1, k2, k3, k4 = jax.random.split(key, 5)

    x = jax.random.normal(kx, (B, L, H), dtype=jnp.float32)
    # Conv1d(hidden, hidden, kernel_size=1) weights: (H_out, H_in) with k squeezed.
    scale = 1.0 / jnp.sqrt(H)
    w1 = jax.random.uniform(k1, (H, H), jnp.float32, -scale, scale)
    b1 = jax.random.uniform(k2, (H,), jnp.float32, -scale, scale)
    w2 = jax.random.uniform(k3, (H, H), jnp.float32, -scale, scale)
    b2 = jax.random.uniform(k4, (H,), jnp.float32, -scale, scale)

    ref = reference_ffn(x, w1, b1, w2, b2)

    # f32 compute path (exact vs. reference).
    out_f32 = jax.block_until_ready(
        pointwise_ffn(x, w1, b1, w2, b2, compute_dtype=jnp.float32))
    assert out_f32.shape == (B, L, H)
    assert jnp.allclose(out_f32, ref, atol=1e-5, rtol=1e-5), "f32 mismatch vs reference"

    # Default path: bf16 MXU operands, f32 accumulation, f32 residual on un-cast x.
    out_bf16 = jax.block_until_ready(pointwise_ffn(x, w1, b1, w2, b2))
    assert out_bf16.shape == (B, L, H)
    assert jnp.allclose(out_bf16, ref, atol=1e-1, rtol=1e-1), "bf16 mismatch vs reference"

    print("KERNEL_OK")
</pallas_src>

<mosaic_0001>
module attributes {stable_mosaic.version = 11 : i64} {
  func.func @_ffn_kernel(%arg0: i32, %arg1: memref<8x32xf32, #tpu.memory_space<vmem>>, %arg2: memref<32x32xf32, #tpu.memory_space<vmem>>, %arg3: memref<1x32xf32, #tpu.memory_space<vmem>>, %arg4: memref<32x32xf32, #tpu.memory_space<vmem>>, %arg5: memref<1x32xf32, #tpu.memory_space<vmem>>, %arg6: memref<8x32xf32, #tpu.memory_space<vmem>>) attributes {dimension_semantics = [#tpu.dimension_semantics<parallel>], iteration_bounds = array<i64: 2>, scalar_prefetch = 0 : i64, scratch_operands = 0 : i64, tpu.core_type = #tpu.core_type<tc>, window_params = [{transform_indices = @transform_0, window_bounds = array<i64: 8, 32>}, {pipeline_mode = #tpu.pipeline_mode<synchronous>, transform_indices = @transform_1, window_bounds = array<i64: 32, 32>}, {pipeline_mode = #tpu.pipeline_mode<synchronous>, transform_indices = @transform_2, window_bounds = array<i64: 1, 32>}, {pipeline_mode = #tpu.pipeline_mode<synchronous>, transform_indices = @transform_3, window_bounds = array<i64: 32, 32>}, {pipeline_mode = #tpu.pipeline_mode<synchronous>, transform_indices = @transform_4, window_bounds = array<i64: 1, 32>}, {transform_indices = @transform_5, window_bounds = array<i64: 8, 32>}]} {
    %c0 = arith.constant 0 : index
    %c0_0 = arith.constant 0 : index
    %0 = vector.load %arg1[%c0, %c0_0] : memref<8x32xf32, #tpu.memory_space<vmem>>, vector<8x32xf32>
    %c0_1 = arith.constant 0 : index
    %c0_2 = arith.constant 0 : index
    %1 = vector.load %arg2[%c0_1, %c0_2] : memref<32x32xf32, #tpu.memory_space<vmem>>, vector<32x32xf32>
    %cst = arith.constant dense<0.000000e+00> : vector<8x32xf32>
    %2 = tpu.matmul %0, %1, %cst {dimension_numbers = #tpu.dot_dimension_numbers<[1], [0], [0], [1], [0, 0, 1, 1], [], []>} : vector<8x32xf32>, vector<32x32xf32>, vector<8x32xf32> -> vector<8x32xf32>
    %c0_3 = arith.constant 0 : index
    %c0_4 = arith.constant 0 : index
    %3 = vector.load %arg3[%c0_3, %c0_4] : memref<1x32xf32, #tpu.memory_space<vmem>>, vector<1x32xf32>
    %4 = vector.broadcast %3 : vector<1x32xf32> to vector<8x32xf32>
    %5 = arith.addf %2, %4 : vector<8x32xf32>
    %cst_5 = arith.constant 0.000000e+00 : f32
    %6 = vector.broadcast %cst_5 : f32 to vector<8x32xf32>
    %7 = arith.maximumf %5, %6 : vector<8x32xf32>
    %c0_6 = arith.constant 0 : index
    %c0_7 = arith.constant 0 : index
    %8 = vector.load %arg4[%c0_6, %c0_7] : memref<32x32xf32, #tpu.memory_space<vmem>>, vector<32x32xf32>
    %cst_8 = arith.constant dense<0.000000e+00> : vector<8x32xf32>
    %9 = tpu.matmul %7, %8, %cst_8 {dimension_numbers = #tpu.dot_dimension_numbers<[1], [0], [0], [1], [0, 0, 1, 1], [], []>} : vector<8x32xf32>, vector<32x32xf32>, vector<8x32xf32> -> vector<8x32xf32>
    %c0_9 = arith.constant 0 : index
    %c0_10 = arith.constant 0 : index
    %10 = vector.load %arg5[%c0_9, %c0_10] : memref<1x32xf32, #tpu.memory_space<vmem>>, vector<1x32xf32>
    %11 = vector.broadcast %10 : vector<1x32xf32> to vector<8x32xf32>
    %12 = arith.addf %9, %11 : vector<8x32xf32>
    %13 = arith.addf %12, %0 : vector<8x32xf32>
    %c0_11 = arith.constant 0 : index
    %c0_12 = arith.constant 0 : index
    %14 = vector.load %arg6[%c0_11, %c0_12] : memref<8x32xf32, #tpu.memory_space<vmem>>, vector<8x32xf32>
    tpu.vector_store %arg6[%c0_11, %c0_12], %13 {strides = array<i32>} : memref<8x32xf32, #tpu.memory_space<vmem>>, vector<8x32xf32>,
    return
  }
  func.func @transform_0(%arg0: i32) -> (i32, i32) {
    %c0_i32 = arith.constant 0 : i32
    %c0_i32_0 = arith.constant 0 : i32
    return %arg0, %c0_i32 : i32, i32
  }
  func.func @transform_1(%arg0: i32) -> (i32, i32) {
    %c0_i32 = arith.constant 0 : i32
    %c0_i32_0 = arith.constant 0 : i32
    %c0_i32_1 = arith.constant 0 : i32
    return %c0_i32, %c0_i32_0 : i32, i32
  }
  func.func @transform_2(%arg0: i32) -> (i32, i32) {
    %c0_i32 = arith.constant 0 : i32
    %c0_i32_0 = arith.constant 0 : i32
    %c0_i32_1 = arith.constant 0 : i32
    return %c0_i32, %c0_i32_0 : i32, i32
  }
  func.func @transform_3(%arg0: i32) -> (i32, i32) {
    %c0_i32 = arith.constant 0 : i32
    %c0_i32_0 = arith.constant 0 : i32
    %c0_i32_1 = arith.constant 0 : i32
    return %c0_i32, %c0_i32_0 : i32, i32
  }
  func.func @transform_4(%arg0: i32) -> (i32, i32) {
    %c0_i32 = arith.constant 0 : i32
    %c0_i32_0 = arith.constant 0 : i32
    %c0_i32_1 = arith.constant 0 : i32
    return %c0_i32, %c0_i32_0 : i32, i32
  }
  func.func @transform_5(%arg0: i32) -> (i32, i32) {
    %c0_i32 = arith.constant 0 : i32
    %c0_i32_0 = arith.constant 0 : i32
    return %arg0, %c0_i32 : i32, i32
  }
}

</mosaic_0001>

<bundles_post_ra>
// kernel: tpu_custom_call.1
= control target key start
LH: loop header
LB: loop body
LE: loop exit
PB: predicated region body
PF: predicated region fallthrough
CT: control target
= control target key end

     0   :  { %10 = vsyncpa [#allocation3], 0  ;;  %s1120_s0 = inlined_call_operand.hbm [shape: f32[16,32], index: 0, kind: input, shape index: {}]   ;;  %s1121_s1 = inlined_call_operand.hbm [shape: f32[32,32], index: 1, kind: input, shape index: {}]   ;;  %s1122_s2 = inlined_call_operand.vmem [shape: f32[1,32], index: 2, kind: input, shape index: {}]   ;;  %s1123_s3 = inlined_call_operand.hbm [shape: f32[32,32], index: 3, kind: input, shape index: {}]   ;;  %s1124_s4 = inlined_call_operand.vmem [shape: f32[1,32], index: 4, kind: input, shape index: {}]   ;;  %s1125_s5 = inlined_call_operand.hbm [shape: f32[16,32], index: 5, kind: output, shape index: {}]  }
   0x1   :  { %12 = vsyncpa [#allocation3 + $0x1], 0 }
   0x2   :  { %13 = vsyncpa [#allocation6], 0 }
   0x3   :  { %14 = vsyncpa [#allocation4], 0 }
   0x4   :  { %16 = vsyncpa [#allocation4 + $0x1], 0  ;;  %s878_s18 = smov 0   ;;  %s880_s19 = smov 0  }
   0x5   :  { %s882_s20 = smov 0   ;;  %s884_s21 = smov 0  }
   0x6 LB: > { %s899_s22 = sadd.s32 4294967295, %s837_s21   ;;  %s545_s23 = sadd.s32 4294967294, %s837_s21   ;;  %s837_s21 = sphi %s884_s21, %s1145_s21   ;;  %s833_s20 = sphi %s882_s20, %s1144_s20   ;;  %s829_s19 = sphi %s880_s19, %s1143_s19   ;;  %s825_s18 = sphi %s878_s18, %s1142_s18  }
   0x7   : > { %p42_p0 = scmp.ne.s32.totalorder %s829_s19, %s825_s18  ;;  %p1126_p1 = scmp.eq.s32.totalorder %s899_s22, 0 }
   0x8   : > { %p156_p3 = scmp.eq.s32.totalorder %s545_s23, 1  ;;  %p546_p5 = scmp.ge.s32.totalorder %s837_s21, 1 }
   0x9   : > { %p908_p4 = por %p1126_p1, %p42_p0  ;;  %p163_p7 = scmp.lt.s32.totalorder %s837_s21, 3 }
   0xa   : > { %p913_p6 = por %p156_p3, %p42_p0  ;;  %s839_s27 = smov [#allocation5]  }
   0xb   : > { %s1129_s24 = scalar_select %p908_p4, 1, 0 }
   0xc   : > { %s1130_s25 = scalar_select %p913_p6, 1, 0 }
   0xd   : > { %p918_p8 = pnand %p546_p5, %p163_p7  ;;  %s175_s28 = sshll.u32 %s839_s27, 4  ;;  %s922_s28 = int_to_ptr.vmem [resolvable:$true] %s175_s28 }
   0xe   : > { %s840_s30 = smov [#allocation7]   ;;  %s681_s9 = scalar_lea.hbm %s1121_s1, 512 }
   0xf   : > { %p621_p9 = pneg %p918_p8  ;;  %s191_s6 = sshll.u32 %s840_s30, 4  ;;  %s933_s6 = int_to_ptr.vmem [resolvable:$true] %s191_s6 }
  0x10   : > { %p682_p12 = scmp.ne.s32.totalorder %s1121_s1, %s681_s9  ;;  %p688_p5 = scmp.lt.u32.totalorder %s681_s9, %s1121_s1 }
  0x11   : > { %p929_p11 = pnand %p621_p9, %p1126_p1 }
  0x13   : > { %p683_p13 = pneg %p929_p11 }
  0x15   : > { %p684_p0 = pnand %p683_p13, %p682_p12 }
  0x17   : > { %p685_p3 = pneg %p684_p0 }
  0x19   : > { %p690_p7 = pnand %p688_p5, %p685_p3 }
  0x1b   : > { %693 = shalt.err (!%p690_p7)
}
  0x1c   : > { %s694_s14 = scalar_lea.vmem %s922_s28, 512  ;;  %p702_p2 = scmp.lt.s32.totalorder %s922_s28, %s922_s28 }
  0x1d   : > { %p695_p9 = scmp.ne.s32.totalorder %s922_s28, %s694_s14  ;;  %p703_p12 = scmp.lt.s32.totalorder %s694_s14, %s694_s14 }
  0x1f   : > { %p697_p10 = pnand %p695_p9, %p683_p13  ;;  %p704_p0 = por %p703_p12, %p702_p2 }
  0x21   : > { %p698_p1 = pneg %p697_p10 }
  0x23   : > { %p705_p6 = pnand %p704_p0, %p698_p1 }
  0x25   : > { %708 = shalt.err (!%p705_p6)
}
  0x26   : > { %s841_s15 = smov 128   ;;  %s842_s16 = smov 8  }
  0x27   : > { %624 = dma.hbm_to_vmem [thread:$0]  (!%p929_p11), %s1121_s1, 512, %s922_s28, [#allocation6], %s841_s15, %s841_s15, %s842_s16  }
  0x28   : > { %s709_s7 = scalar_lea.hbm %s1123_s3, 512 }
  0x29   : > { %p710_p2 = scmp.ne.s32.totalorder %s1123_s3, %s709_s7  ;;  %p716_p10 = scmp.lt.u32.totalorder %s709_s7, %s1123_s3 }
  0x2b   : > { %p712_p1 = pnand %p710_p2, %p683_p13 }
  0x2d   : > { %p713_p6 = pneg %p712_p1 }
  0x2f   : > { %p718_p3 = pnand %p716_p10, %p713_p6 }
  0x31   : > { %721 = shalt.err (!%p718_p3)
}
  0x32   : > { %s722_s28 = scalar_lea.vmem %s933_s6, 512  ;;  %p730_p12 = scmp.lt.s32.totalorder %s933_s6, %s933_s6 }
  0x33   : > { %p723_p5 = scmp.ne.s32.totalorder %s933_s6, %s722_s28  ;;  %p731_p0 = scmp.lt.s32.totalorder %s722_s28, %s722_s28 }
  0x35   : > { %p725_p7 = pnand %p723_p5, %p683_p13  ;;  %p732_p2 = por %p731_p0, %p730_p12 }
  0x37   : > { %p726_p9 = pneg %p725_p7 }
  0x39   : > { %p733_p1 = pnand %p732_p2, %p726_p9 }
  0x3b   : > { %736 = shalt.err (!%p733_p1)
}
  0x3c   : > { %627 = dma.hbm_to_vmem [thread:$0]  (!%p929_p11), %s1123_s3, 512, %s933_s6, [#allocation6], %s841_s15, %s841_s15, %s842_s16  }
  0x3d   : > { %s988_s14 = sadd.s32 1, %s837_s21   ;;  %s29_s29 = sadd.s32 1, %s833_s20 }
  0x3e   : > { %s26_s17 = ssub.s32 %s837_s21, %s988_s14  ;;  %p36_p13 = scmp.ne.s32.totalorder %s833_s20, %s829_s19 }
  0x3f   : > { %p27_p6 = scmp.eq.s32.totalorder %s26_s17, 0  ;;  %p37_p10 = scmp.eq.s32.totalorder %s837_s21, 0 }
  0x40   : > { %p1133_p3 = scmp.eq.s32.totalorder %s899_s22, 1  ;;  %p638_p7 = scmp.lt.s32.totalorder %s837_s21, 2 }
  0x41   : > { %s1004_s27 = scalar_select %p27_p6, %s833_s20, %s29_s29  }
  0x42   : > { %p998_p5 = por %p1133_p3, %p36_p13  ;;  %p38_p9 = por %p37_p10, %p36_p13 }
  0x43   : > { %s208_s30 = sand.u32 1, %s833_s20   ;;  %s551_s6 = sshll.u32 %s837_s21, 7 }
  0x44   : > { %s1134_s23 = scalar_select %p998_p5, 1, 0 }
  0x45   : > { %s550_s7 = sshll.u32 %s208_s30, 3  ;;  %s1011_s8 = scalar_lea.hbm %s1120_s0, %s551_s6 }
  0x46   : > { %s212_s9 = scalar_lea.vmem [#allocation2], %s550_s7  ;;  %p1015_p11 = pnand %p638_p7, %p38_p9 }
  0x47   : > { %s219_s10 = sshll.u32 %s212_s9, 4  ;;  %s209_s28 = scalar_lea.sflag [#allocation3], %s208_s30  ;;  %s1013_s10 = int_to_ptr.vmem [resolvable:$true] %s219_s10 }
  0x48   : > { %s737_s12 = scalar_lea.hbm %s1011_s8, 128  ;;  %p739_p0 = pneg %p1015_p11 }
  0x49   : > { %p738_p12 = scmp.ne.s32.totalorder %s1011_s8, %s737_s12  ;;  %s742_s17 = scalar_lea.hbm %s1120_s0, 256 }
  0x4a   : > { %p743_p13 = scmp.lt.u32.totalorder %s1011_s8, %s1120_s0  ;;  %p744_p6 = scmp.lt.u32.totalorder %s742_s17, %s737_s12 }
  0x4b   : > { %p740_p2 = pnand %p739_p0, %p738_p12  ;;  %p746_p3 = scmp.lt.u32.totalorder %s737_s12, %s1011_s8 }
  0x4c   : > { %p745_p10 = por %p744_p6, %p743_p13 }
  0x4d   : > { %p741_p1 = pneg %p740_p2 }
  0x4e   : > { %p747_p7 = por %p746_p3, %p745_p10 }
  0x50   : > { %p748_p9 = pnand %p747_p7, %p741_p1 }
  0x52   : > { %751 = shalt.err (!%p748_p9)
}
  0x53   : > { %s752_s30 = scalar_lea.vmem %s1013_s10, 128  ;;  %s843_s15 = smov [#allocation2]  }
  0x54   : > { %p753_p12 = scmp.ne.s32.totalorder %s1013_s10, %s752_s30  ;;  %s757_s16 = sshll.u32 %s843_s15, 4  ;;  %s758_s16 = int_to_ptr.vmem [resolvable:$false] %s757_s16 }
  0x55   : > { %s759_s9 = scalar_lea.vmem %s758_s16, 256  ;;  %p760_p4 = scmp.lt.s32.totalorder %s1013_s10, %s758_s16 }
  0x56   : > { %p755_p2 = pnand %p753_p12, %p739_p0  ;;  %p761_p13 = scmp.lt.s32.totalorder %s759_s9, %s752_s30 }
  0x58   : > { %p756_p5 = pneg %p755_p2  ;;  %p762_p6 = por %p761_p13, %p760_p4 }
  0x5a   : > { %p763_p10 = pnand %p762_p6, %p756_p5 }
  0x5c   : > { %766 = shalt.err (!%p763_p10)
}
  0x5d   : > { %631 = dma.hbm_to_vmem [thread:$0]  (!%p1015_p11), %s1011_s8, 128, %s1013_s10, %s209_s28  }
  0x5e   : > { %228 = sbr.rel (%p918_p8) target bundleno = 561 (0x231), region = 40  ;;  %s1047_s12 = sand.u32 (!%p918_p8), 1, %s829_s19  }
  0x5f   : > { %s553_s13 = sshll.u32 (!%p918_p8), %s1047_s12, 3  ;;  %s231_s29 = scalar_lea.sflag (!%p918_p8), [#allocation3], %s1047_s12 }
  0x60   : > { %s234_s17 = scalar_lea.vmem (!%p918_p8), [#allocation2], %s553_s13  ;;  %p1136_p4 = scmp.ne.s32.totalorder (!%p918_p8), %s1129_s24, 0 }
  0x65   : > { %812 = dma.done.wait (%p1136_p4), %s231_s29, 128  }
  0x66   : > { %814 = vsyncadd (%p1136_p4), %s231_s29, 4294967168  ;;  %p1137_p5 = scmp.eq.s32.totalorder %s899_s22, 0 }
  0x68   : > { %816 = dma.done.wait (%p1137_p5), [#allocation6], 1024   ;;  %p1138_p8 = pmov %p1137_p5 }
  0x69   : > { %v844_v0 = vmov 0.0|0.0   ;;  %vm845_vm0 = vmmov 0   ;;  %v846_v1 = vmov 0.0   ;;  %v270_v2 = vld [vmem:[#allocation5] sm:$0xff]  ;;  %v271_v3 = vld [vmem:[#allocation5 + $0x8] sm:$0xff]  ;;  %v272_v4 = vld [vmem:[#allocation5 + $0x10] sm:$0xff] }
  0x6a   : > { %818 = vsyncadd (%p1138_p8), [#allocation6], 4294966272  ;;  %597 = vmatprep.subr.bf16.mxu0 %v844_v0  ;;  %583 = vmatprep.mubr.msk.f32.mxu0 %vm845_vm0, %v846_v1  ;;  %v598_v5 = vpack.c.bf16 %v271_v3, %v270_v2  ;;  %v273_v6 = vld [vmem:[#allocation5 + $0x18] sm:$0xff]  ;;  %v356_v7 = vld [vmem:[#allocation7] sm:$0xff]  ;;  %vm281_vm1 = vcmask 261120   ;;  %s562_s11 = sshll.u32 %s899_s22, 7 }
  0x6b   : > { %603 = vmatprep.subr.bf16.mxu1 %v844_v0  ;;  %594 = vmatprep.mubr.msk.f32.mxu1 %vm845_vm0, %v846_v1  ;;  %v357_v8 = vld [vmem:[#allocation7 + $0x8] sm:$0xff]  ;;  %v601_v9 = vpack.c.bf16 %v273_v6, %v272_v4  ;;  %v269_v11 = vld [vmem:[%s234_s17] sm:$0xff]  ;;  %s268_s28 = scalar_lea.vmem [#allocation8], %s553_s13  ;;  %s1075_s15 = scalar_lea.hbm %s1125_s5, %s562_s11 }
  0x6c   : > { %599 = vmatpush3.bf16.msra.mxu0 %v598_v5  ;;  %v604_v10 = vpack.c.bf16 %v357_v8, %v356_v7  ;;  %v358_v12 = vld [vmem:[#allocation7 + $0x10] sm:$0xff]  ;;  %v359_v13 = vld [vmem:[#allocation7 + $0x18] sm:$0xff]  ;;  %s456_s7 = sshll.u32 %s268_s28, 4  ;;  %s443_s16 = scalar_lea.sflag [#allocation4], %s1047_s12  ;;  %s1077_s7 = int_to_ptr.vmem [resolvable:$true] %s456_s7 }
  0x6d   : > { %600 = vmatprep.subr.bf16.mxu0 %v844_v0  ;;  %v607_v14 = vpack.c.bf16 %v359_v13, %v358_v12  ;;  %v557_v15 = vld [vmem:[%s1122_s2] ss:$0 sm:$0xff]  ;;  %s767_s22 = scalar_lea.vmem %s1077_s7, 128  ;;  %p1139_p0 = scmp.ne.s32.totalorder %s1134_s23, 0 }
  0x6e   : > { %605 = vmatpush3.bf16.msra.mxu1 %v604_v10  ;;  %v559_v20 = vld [vmem:[%s1124_s4] ss:$0 sm:$0xff]  ;;  %p768_p11 = scmp.ne.s32.totalorder %s1077_s7, %s767_s22  ;;  %s847_s9 = smov [#allocation8]  }
  0x6f   : > { %606 = vmatprep.subr.bf16.mxu1 %v844_v0  ;;  %s771_s13 = sshll.u32 %s847_s9, 4  ;;  %s772_s13 = int_to_ptr.vmem [resolvable:$false] %s771_s13 }
  0x70   : > { %602 = vmatpush3.bf16.msra.mxu0 %v601_v9  ;;  %p769_p1 = pnand %p768_p11, %p1139_p0  ;;  %s773_s29 = scalar_lea.vmem %s772_s13, 256 }
  0x71   : > { %p774_p7 = scmp.lt.s32.totalorder %s1077_s7, %s772_s13  ;;  %p775_p9 = scmp.lt.s32.totalorder %s773_s29, %s767_s22 }
  0x72   : > { %608 = vmatpush3.bf16.msra.mxu1 %v607_v14  ;;  %p770_p3 = pneg %p769_p1 }
  0x73   : > { %584 = vmatmul.mubr.msk.f32.vlgmr.msra.gmra.mrb[0].mxu0 %vm281_vm1, %v269_v11  ;;  %p776_p12 = por %p775_p9, %p774_p7 }
  0x75   : > { %p777_p2 = pnand %p776_p12, %p770_p3 }
 0x146   : > { %v351_v16 = vpop.f32.mrb[0].mxu0 }
 0x147   : > { %v352_v17 = vadd.f32 %v557_v15, %v351_v16  ;;  %v585_v18 = vpop.f32.mrb[1].mxu0 }
 0x149   : > { %v355_v19 = vmax.f32 %v352_v17, 0.0 }
 0x14b   : > { %595 = vmatmul.mubr.msk.f32.vlgmr.msra.gmra.mrb[0].mxu1 %vm281_vm1, %v355_v19 }
 0x21e   : > { %v436_v21 = vpop.f32.mrb[0].mxu1 }
 0x21f   : > { %v437_v22 = vadd.f32 %v559_v20, %v436_v21  ;;  %v596_v23 = vpop.f32.mrb[1].mxu1 }
 0x221   : > { %v440_v24 = vadd.f32 %v437_v22, %v269_v11 }
 0x223   : > { %441 = vst.msk [vmem:[%s268_s28] sm:$0xff] %vm281_vm1, %v440_v24 }
 0x224   : > { %780 = shalt.err (!%p777_p2)
}
 0x225   : > { %s781_s12 = scalar_lea.hbm %s1075_s15, 128  ;;  %s785_s26 = scalar_lea.hbm %s1125_s5, 256 }
 0x226   : > { %p782_p13 = scmp.ne.s32.totalorder %s1075_s15, %s781_s12  ;;  %p786_p4 = scmp.lt.u32.totalorder %s1075_s15, %s1125_s5 }
 0x227   : > { %p787_p5 = scmp.lt.u32.totalorder %s785_s26, %s781_s12  ;;  %p789_p11 = scmp.lt.u32.totalorder %s781_s12, %s1075_s15 }
 0x228   : > { %p783_p6 = pnand %p782_p13, %p1139_p0 }
 0x229   : > { %p788_p8 = por %p787_p5, %p786_p4 }
 0x22a   : > { %p784_p10 = pneg %p783_p6 }
 0x22b   : > { %p790_p1 = por %p789_p11, %p788_p8 }
 0x22d   : > { %p791_p3 = pnand %p790_p1, %p784_p10 }
 0x22f   : > { %794 = shalt.err (!%p791_p3)
}
 0x230   : > { %619 = dma.vmem_to_hbm [thread:$0]  (%p1139_p0), %s1077_s7, 128, %s1075_s15, %s443_s16  }
 0x231 PF: > { %s468_s11 = sand.u32 1, %s825_s18   ;;  %p1140_p7 = scmp.ne.s32.totalorder %s1130_s25, 0 }
 0x232   : > { %p1141_p9 = scmp.ge.s32.totalorder %s837_s21, 2  ;;  %s469_s28 = scalar_lea.sflag [#allocation4], %s468_s11 }
 0x234   : > { %p633_p12 = pnand %p1141_p9, %p1140_p7 }
 0x236   : > { %820 = dma.done.wait (!%p633_p12), %s469_s28, 128  }
 0x237   : > { %822 = vsyncadd (!%p633_p12), %s469_s28, 4294967168  ;;  %p19_p2 = scmp.ge.s32.totalorder %s988_s14, 4   ;;  %s1142_s18 = smov %s829_s19 }
 0x238   : > { %s1143_s19 = smov %s833_s20  ;;  %s1144_s20 = smov %s1004_s27 }
 0x239   : > { %s1145_s21 = smov %s988_s14  ;;  %21 = sbr.rel (!%p19_p2) target bundleno = 6 (0x6), region = 93 }
 0x240   :  { %474 = vsyncpa [#allocation3], 1 }
 0x241   :  { %476 = vsyncpa [#allocation3 + $0x1], 1 }
 0x242   :  { %477 = vsyncpa [#allocation6], 1 }
 0x243   :  { %478 = vsyncpa [#allocation4], 1 }
 0x244   :  { %480 = vsyncpa [#allocation4 + $0x1], 1 }

</bundles_post_ra>
